<compile_context>
chip_gen: v7x
topology: tpu7x:2x2x1
jax: 0.10.0
libtpu: 0.0.40
codegen_flags: <defaults>
</compile_context>

<pallas_src>
import jax
import jax.numpy as jnp
from jax.experimental import pallas as pl
from jax.experimental.pallas import tpu as pltpu


# ---------------------------------------------------------------------------
# Kernel
# ---------------------------------------------------------------------------
def _mlp_kernel(x_ref, w1_ref, b1_ref, w2_ref, b2_ref, w3_ref, b3_ref, o_ref):
    """Fused 3-layer MLP on one (tb, in_d) batch tile. Weights are VMEM-resident
    and already in the MXU dtype (cast once on the host); biases are f32."""
    mxu_dt = w1_ref.dtype
    # Exact f32 MXU passes when weights are f32; bf16 operands are natively exact.
    prec = jax.lax.Precision.HIGHEST if mxu_dt == jnp.float32 else None

    # Layer 1: Linear + ReLU   (f32 accumulate, bias/ReLU in f32)
    x = x_ref[...].astype(mxu_dt)
    h1 = jnp.dot(x, w1_ref[...], preferred_element_type=jnp.float32, precision=prec)
    h1 = jnp.maximum(h1 + b1_ref[...], 0.0)

    # Layer 2: Linear + ReLU
    h2 = jnp.dot(h1.astype(mxu_dt), w2_ref[...],
                 preferred_element_type=jnp.float32, precision=prec)
    h2 = jnp.maximum(h2 + b2_ref[...], 0.0)

    # Layer 3: Linear (no activation). Output slab is lane-padded to 128 -> unmasked stores.
    out = jnp.dot(h2.astype(mxu_dt), w3_ref[...],
                  preferred_element_type=jnp.float32, precision=prec)
    o_ref[...] = (out + b3_ref[...]).astype(o_ref.dtype)


# ---------------------------------------------------------------------------
# Host-side helpers
# ---------------------------------------------------------------------------
def _cdiv(a, b):
    return (a + b - 1) // b


def _round_up(n, m):
    return ((n + m - 1) // m) * m


def init_params(key, input_dim, hidden, output_dim):
    """PyTorch nn.Linear default init: U(-1/sqrt(fan_in), +1/sqrt(fan_in))."""
    ks = jax.random.split(key, 6)

    def lin(kw, kb, fan_in, fan_out):
        bound = 1.0 / (fan_in ** 0.5)
        w = jax.random.uniform(kw, (fan_in, fan_out), jnp.float32, -bound, bound)
        b = jax.random.uniform(kb, (1, fan_out), jnp.float32, -bound, bound)
        return w, b

    w1, b1 = lin(ks[0], ks[1], input_dim, hidden)
    w2, b2 = lin(ks[2], ks[3], hidden, hidden)
    w3, b3 = lin(ks[4], ks[5], hidden, output_dim)
    return {"w1": w1, "b1": b1, "w2": w2, "b2": b2, "w3": w3, "b3": b3}


def pad_params(params, lane=128, mxu_dtype=jnp.bfloat16):
    """Prepare parameters ONCE (outside the forward):

      * hidden / output feature dims zero-padded to multiples of `lane`
        (numerically exact: padded weight rows/cols and bias entries are 0 and
        ReLU(0)=0, so real output columns are untouched),
      * weights cast to `mxu_dtype` on the host (no per-step casts in the kernel),
      * biases kept f32 (added to the f32 accumulator),
      * the input-feature dim is deliberately NOT padded (x keeps its true last dim).
    """
    in_d, hid = params["w1"].shape
    out_d = params["w3"].shape[1]
    hid_p = _round_up(hid, lane)
    out_p = _round_up(out_d, lane)

    def pad2(a, rows, cols, dtype):
        a = jnp.pad(a, ((0, rows - a.shape[0]), (0, cols - a.shape[1])))
        return a.astype(dtype)

    return {
        "w1": pad2(params["w1"], in_d, hid_p, mxu_dtype),
        "b1": pad2(params["b1"], 1, hid_p, jnp.float32),
        "w2": pad2(params["w2"], hid_p, hid_p, mxu_dtype),
        "b2": pad2(params["b2"], 1, hid_p, jnp.float32),
        "w3": pad2(params["w3"], hid_p, out_p, mxu_dtype),
        "b3": pad2(params["b3"], 1, out_p, jnp.float32),
    }


def net_generic_forward(x, padded_params, output_dim, *, tile_batch=1024):
    """Forward pass of Net_Generic as a batch-tiled fused Pallas kernel.

    x:              (batch, input_dim) float32 (unpadded feature dim)
    padded_params:  output of pad_params()
    output_dim:     logical (unpadded) output feature count
    """
    p = padded_params
    in_d, hid_p = p["w1"].shape
    out_p = p["w3"].shape[1]

    batch = x.shape[0]
    assert x.shape[1] == in_d, "x last dim must equal the (unpadded) input_dim"

    # --- batch tiling ------------------------------------------------------
    #  * big tiles (default up to 1024 rows) to amortize ~0.35us/step grid overhead,
    #  * >= 2 grid steps for batch >= 16 so both v7x TensorCores get work,
    #  * tb rounded to 8 sublanes; batch padded minimally (a few rows at most).
    tile_batch = max(8, _round_up(tile_batch, 8))
    num_tiles = max(_cdiv(batch, tile_batch), 2 if batch >= 16 else 1)
    if num_tiles == 1:
        tb = batch                      # block == full array dim -> legal for any batch
        batch_p = batch
    else:
        tb = _round_up(_cdiv(batch, num_tiles), 8)
        batch_p = _round_up(batch, tb)
        if batch_p != batch:
            x = jnp.pad(x, ((0, batch_p - batch), (0, 0)))
    grid = (batch_p // tb,)

    out = pl.pallas_call(
        _mlp_kernel,
        out_shape=jax.ShapeDtypeStruct((batch_p, out_p), jnp.float32),
        grid_spec=pltpu.PrefetchScalarGridSpec(
            num_scalar_prefetch=0,
            grid=grid,
            in_specs=[
                # x: tiled along batch, true (unpadded) feature width -> no DMA inflation.
                pl.BlockSpec((tb, in_d), lambda i: (i, 0)),
                # Weights/biases: constant index_map -> VMEM-resident across grid steps.
                pl.BlockSpec((in_d, hid_p), lambda i: (0, 0)),
                pl.BlockSpec((1, hid_p), lambda i: (0, 0)),
                pl.BlockSpec((hid_p, hid_p), lambda i: (0, 0)),
                pl.BlockSpec((1, hid_p), lambda i: (0, 0)),
                pl.BlockSpec((hid_p, out_p), lambda i: (0, 0)),
                pl.BlockSpec((1, out_p), lambda i: (0, 0)),
            ],
            out_specs=pl.BlockSpec((tb, out_p), lambda i: (i, 0)),
        ),
        compiler_params=pltpu.CompilerParams(
            dimension_semantics=("parallel",),   # megacore-shardable batch axis on v7x
        ),
    )(x, p["w1"], p["b1"], p["w2"], p["b2"], p["w3"], p["b3"])
    # TODO(synk): if hidden grows so that resident weights exceed ~24 MiB (v7x VMEM),
    # add a K-tiled grid axis + f32 accumulator and an explicit vmem_limit_bytes.

    # Slice away batch padding and lane padding (lane-dense slab inside the kernel).
    return out[:batch, :output_dim]


def reference_forward(x, p):
    dot = lambda a, b: jnp.dot(a, b, precision=jax.lax.Precision.HIGHEST)
    h1 = jnp.maximum(dot(x, p["w1"]) + p["b1"], 0.0)
    h2 = jnp.maximum(dot(h1, p["w2"]) + p["b2"], 0.0)
    return dot(h2, p["w3"]) + p["b3"]


# ---------------------------------------------------------------------------
# Self-test
# ---------------------------------------------------------------------------
if __name__ == "__main__":
    key = jax.random.PRNGKey(0)
    k_x, k_x2, k_p = jax.random.split(key, 3)

    input_dim, hidden, output_dim = 16, 32, 8
    params = init_params(k_p, input_dim, hidden, output_dim)

    # Pad/cast once, outside the forward.
    pp_f32 = pad_params(params, mxu_dtype=jnp.float32)   # exact-check path
    pp_bf16 = pad_params(params)                          # default bf16 fast path

    # --- small batch, single tile ---
    batch = 8
    x = jax.random.normal(k_x, (batch, input_dim), dtype=jnp.float32)
    ref = reference_forward(x, params)
    out = jax.block_until_ready(net_generic_forward(x, pp_f32, output_dim))
    assert out.shape == (batch, output_dim)
    assert jnp.allclose(out, ref, atol=1e-4, rtol=1e-4), "f32 small-batch mismatch"

    # --- larger non-multiple batch: multi-step parallel grid + minimal batch pad ---
    batch2 = 300
    x2 = jax.random.normal(k_x2, (batch2, input_dim), dtype=jnp.float32)
    ref2 = reference_forward(x2, params)
    out2 = jax.block_until_ready(net_generic_forward(x2, pp_f32, output_dim))
    assert out2.shape == (batch2, output_dim)
    assert jnp.allclose(out2, ref2, atol=1e-4, rtol=1e-4), "f32 tiled-batch mismatch"

    # --- bf16-weight fast path: f32 accumulation bounds the error ---
    out_bf16 = jax.block_until_ready(net_generic_forward(x2, pp_bf16, output_dim))
    assert out_bf16.shape == (batch2, output_dim)
    assert jnp.allclose(out_bf16, ref2, atol=1e-1, rtol=1e-1), "bf16 path mismatch"

    print("KERNEL_OK")
</pallas_src>

<mosaic_0001>
module attributes {stable_mosaic.version = 11 : i64} {
  func.func @_mlp_kernel(%arg0: i32, %arg1: memref<8x16xf32, #tpu.memory_space<vmem>>, %arg2: memref<16x128xf32, #tpu.memory_space<vmem>>, %arg3: memref<1x128xf32, #tpu.memory_space<vmem>>, %arg4: memref<128x128xf32, #tpu.memory_space<vmem>>, %arg5: memref<1x128xf32, #tpu.memory_space<vmem>>, %arg6: memref<128x128xf32, #tpu.memory_space<vmem>>, %arg7: memref<1x128xf32, #tpu.memory_space<vmem>>, %arg8: memref<8x128xf32, #tpu.memory_space<vmem>>) attributes {dimension_semantics = [#tpu.dimension_semantics<parallel>], iteration_bounds = array<i64: 1>, scalar_prefetch = 0 : i64, scratch_operands = 0 : i64, tpu.core_type = #tpu.core_type<tc>, window_params = [{transform_indices = @transform_0, window_bounds = array<i64: 8, 16>}, {pipeline_mode = #tpu.pipeline_mode<synchronous>, transform_indices = @transform_1, window_bounds = array<i64: 16, 128>}, {pipeline_mode = #tpu.pipeline_mode<synchronous>, transform_indices = @transform_2, window_bounds = array<i64: 1, 128>}, {pipeline_mode = #tpu.pipeline_mode<synchronous>, transform_indices = @transform_3, window_bounds = array<i64: 128, 128>}, {pipeline_mode = #tpu.pipeline_mode<synchronous>, transform_indices = @transform_4, window_bounds = array<i64: 1, 128>}, {pipeline_mode = #tpu.pipeline_mode<synchronous>, transform_indices = @transform_5, window_bounds = array<i64: 128, 128>}, {pipeline_mode = #tpu.pipeline_mode<synchronous>, transform_indices = @transform_6, window_bounds = array<i64: 1, 128>}, {transform_indices = @transform_7, window_bounds = array<i64: 8, 128>}]} {
    %c0 = arith.constant 0 : index
    %c0_0 = arith.constant 0 : index
    %0 = vector.load %arg1[%c0, %c0_0] : memref<8x16xf32, #tpu.memory_space<vmem>>, vector<8x16xf32>
    %c0_1 = arith.constant 0 : index
    %c0_2 = arith.constant 0 : index
    %1 = vector.load %arg2[%c0_1, %c0_2] : memref<16x128xf32, #tpu.memory_space<vmem>>, vector<16x128xf32>
    %cst = arith.constant dense<0.000000e+00> : vector<8x128xf32>
    %2 = tpu.matmul %0, %1, %cst {dimension_numbers = #tpu.dot_dimension_numbers<[1], [0], [0], [1], [0, 0, 1, 1], [], []>, precision = #tpu.contract_precision<fp32>} : vector<8x16xf32>, vector<16x128xf32>, vector<8x128xf32> -> vector<8x128xf32>
    %c0_3 = arith.constant 0 : index
    %c0_4 = arith.constant 0 : index
    %3 = vector.load %arg3[%c0_3, %c0_4] : memref<1x128xf32, #tpu.memory_space<vmem>>, vector<1x128xf32>
    %4 = vector.broadcast %3 : vector<1x128xf32> to vector<8x128xf32>
    %5 = arith.addf %2, %4 : vector<8x128xf32>
    %cst_5 = arith.constant 0.000000e+00 : f32
    %6 = vector.broadcast %cst_5 : f32 to vector<8x128xf32>
    %7 = arith.maximumf %5, %6 : vector<8x128xf32>
    %c0_6 = arith.constant 0 : index
    %c0_7 = arith.constant 0 : index
    %8 = vector.load %arg4[%c0_6, %c0_7] : memref<128x128xf32, #tpu.memory_space<vmem>>, vector<128x128xf32>
    %cst_8 = arith.constant dense<0.000000e+00> : vector<8x128xf32>
    %9 = tpu.matmul %7, %8, %cst_8 {dimension_numbers = #tpu.dot_dimension_numbers<[1], [0], [0], [1], [0, 0, 1, 1], [], []>, precision = #tpu.contract_precision<fp32>} : vector<8x128xf32>, vector<128x128xf32>, vector<8x128xf32> -> vector<8x128xf32>
    %c0_9 = arith.constant 0 : index
    %c0_10 = arith.constant 0 : index
    %10 = vector.load %arg5[%c0_9, %c0_10] : memref<1x128xf32, #tpu.memory_space<vmem>>, vector<1x128xf32>
    %11 = vector.broadcast %10 : vector<1x128xf32> to vector<8x128xf32>
    %12 = arith.addf %9, %11 : vector<8x128xf32>
    %cst_11 = arith.constant 0.000000e+00 : f32
    %13 = vector.broadcast %cst_11 : f32 to vector<8x128xf32>
    %14 = arith.maximumf %12, %13 : vector<8x128xf32>
    %c0_12 = arith.constant 0 : index
    %c0_13 = arith.constant 0 : index
    %15 = vector.load %arg6[%c0_12, %c0_13] : memref<128x128xf32, #tpu.memory_space<vmem>>, vector<128x128xf32>
    %cst_14 = arith.constant dense<0.000000e+00> : vector<8x128xf32>
    %16 = tpu.matmul %14, %15, %cst_14 {dimension_numbers = #tpu.dot_dimension_numbers<[1], [0], [0], [1], [0, 0, 1, 1], [], []>, precision = #tpu.contract_precision<fp32>} : vector<8x128xf32>, vector<128x128xf32>, vector<8x128xf32> -> vector<8x128xf32>
    %c0_15 = arith.constant 0 : index
    %c0_16 = arith.constant 0 : index
    %17 = vector.load %arg7[%c0_15, %c0_16] : memref<1x128xf32, #tpu.memory_space<vmem>>, vector<1x128xf32>
    %18 = vector.broadcast %17 : vector<1x128xf32> to vector<8x128xf32>
    %19 = arith.addf %16, %18 : vector<8x128xf32>
    %c0_17 = arith.constant 0 : index
    %c0_18 = arith.constant 0 : index
    %20 = vector.load %arg8[%c0_17, %c0_18] : memref<8x128xf32, #tpu.memory_space<vmem>>, vector<8x128xf32>
    tpu.vector_store %arg8[%c0_17, %c0_18], %19 {strides = array<i32>} : memref<8x128xf32, #tpu.memory_space<vmem>>, vector<8x128xf32>,
    return
  }
  func.func @transform_0(%arg0: i32) -> (i32, i32) {
    %c0_i32 = arith.constant 0 : i32
    %c0_i32_0 = arith.constant 0 : i32
    return %arg0, %c0_i32 : i32, i32
  }
  func.func @transform_1(%arg0: i32) -> (i32, i32) {
    %c0_i32 = arith.constant 0 : i32
    %c0_i32_0 = arith.constant 0 : i32
    %c0_i32_1 = arith.constant 0 : i32
    return %c0_i32, %c0_i32_0 : i32, i32
  }
  func.func @transform_2(%arg0: i32) -> (i32, i32) {
    %c0_i32 = arith.constant 0 : i32
    %c0_i32_0 = arith.constant 0 : i32
    %c0_i32_1 = arith.constant 0 : i32
    return %c0_i32, %c0_i32_0 : i32, i32
  }
  func.func @transform_3(%arg0: i32) -> (i32, i32) {
    %c0_i32 = arith.constant 0 : i32
    %c0_i32_0 = arith.constant 0 : i32
    %c0_i32_1 = arith.constant 0 : i32
    return %c0_i32, %c0_i32_0 : i32, i32
  }
  func.func @transform_4(%arg0: i32) -> (i32, i32) {
    %c0_i32 = arith.constant 0 : i32
    %c0_i32_0 = arith.constant 0 : i32
    %c0_i32_1 = arith.constant 0 : i32
    return %c0_i32, %c0_i32_0 : i32, i32
  }
  func.func @transform_5(%arg0: i32) -> (i32, i32) {
    %c0_i32 = arith.constant 0 : i32
    %c0_i32_0 = arith.constant 0 : i32
    %c0_i32_1 = arith.constant 0 : i32
    return %c0_i32, %c0_i32_0 : i32, i32
  }
  func.func @transform_6(%arg0: i32) -> (i32, i32) {
    %c0_i32 = arith.constant 0 : i32
    %c0_i32_0 = arith.constant 0 : i32
    %c0_i32_1 = arith.constant 0 : i32
    return %c0_i32, %c0_i32_0 : i32, i32
  }
  func.func @transform_7(%arg0: i32) -> (i32, i32) {
    %c0_i32 = arith.constant 0 : i32
    %c0_i32_0 = arith.constant 0 : i32
    return %arg0, %c0_i32 : i32, i32
  }
}

</mosaic_0001>

<bundles_post_ra>
// kernel: tpu_custom_call.1
= control target key start
LH: loop header
LB: loop body
LE: loop exit
PB: predicated region body
PF: predicated region fallthrough
CT: control target
= control target key end

     0   :  { %12 = vsyncpa [#allocation3], 0  ;;  %s3739_s0 = inlined_call_operand.hbm [shape: f32[8,16], index: 0, kind: input, shape index: {}]   ;;  %s3740_s1 = inlined_call_operand.hbm [shape: f32[16,128], index: 1, kind: input, shape index: {}]   ;;  %s3741_s2 = inlined_call_operand.vmem [shape: f32[1,128], index: 2, kind: input, shape index: {}]   ;;  %s3742_s3 = inlined_call_operand.hbm [shape: f32[128,128], index: 3, kind: input, shape index: {}]   ;;  %s3743_s4 = inlined_call_operand.vmem [shape: f32[1,128], index: 4, kind: input, shape index: {}]   ;;  %s3744_s5 = inlined_call_operand.hbm [shape: f32[128,128], index: 5, kind: input, shape index: {}]   ;;  %s3745_s6 = inlined_call_operand.vmem [shape: f32[1,128], index: 6, kind: input, shape index: {}]   ;;  %s3746_s7 = inlined_call_operand.hbm [shape: f32[8,128], index: 7, kind: output, shape index: {}]  }
   0x1   :  { %13 = vsyncpa [#allocation6], 0 }
   0x2   :  { %14 = vsyncpa [#allocation9], 0 }
   0x3   :  { %15 = vsyncpa [#allocation4], 0  ;;  %s3054_s24 = smov [#allocation5]   ;;  %s2936_s28 = scalar_lea.hbm %s3740_s1, 256 }
   0x4   :  { %s31_s25 = sshll.u32 %s3054_s24, 4  ;;  %p2937_p0 = scmp.ne.s32.totalorder %s3740_s1, %s2936_s28  ;;  %s32_s25 = int_to_ptr.vmem [resolvable:$true] %s31_s25 }
   0x5   :  { %p2940_p1 = scmp.lt.u32.totalorder %s2936_s28, %s3740_s1 }
   0x7   :  { %p2942_p2 = pnand %p2940_p1, %p2937_p0 }
   0x9   :  { %2945 = shalt.err (!%p2942_p2)
}
   0xa   :  { %s2946_s10 = scalar_lea.vmem %s32_s25, 256  ;;  %p2951_p4 = scmp.lt.s32.totalorder %s32_s25, %s32_s25 }
   0xb   :  { %p2947_p3 = scmp.ne.s32.totalorder %s32_s25, %s2946_s10  ;;  %p2952_p5 = scmp.lt.s32.totalorder %s2946_s10, %s2946_s10 }
   0xd   :  { %p2953_p6 = por %p2952_p5, %p2951_p4 }
   0xf   :  { %p2954_p7 = pnand %p2953_p6, %p2947_p3 }
  0x11   :  { %2957 = shalt.err (!%p2954_p7)
}
  0x12   :  { %s3055_s11 = smov 128   ;;  %s3056_s12 = smov 8  }
  0x13   :  { %37 = dma.hbm_to_vmem [thread:$0]  %s3740_s1, 256, %s32_s25, [#allocation6], %s3055_s11, %s3055_s11, %s3056_s12  }
  0x14   :  { %s3057_s15 = smov [#allocation2]   ;;  %s3058_s17 = smov [#allocation7]  }
  0x15   :  { %s22_s16 = sshll.u32 %s3057_s15, 4  ;;  %s45_s18 = sshll.u32 %s3058_s17, 4  ;;  %s23_s16 = int_to_ptr.vmem [resolvable:$true] %s22_s16  ;;  %s46_s18 = int_to_ptr.vmem [resolvable:$true] %s45_s18 }
  0x16   :  { %s2958_s21 = scalar_lea.hbm %s3739_s0, 128 }
  0x17   :  { %p2959_p8 = scmp.ne.s32.totalorder %s3739_s0, %s2958_s21  ;;  %p2962_p9 = scmp.lt.u32.totalorder %s2958_s21, %s3739_s0 }
  0x19   :  { %p2964_p10 = pnand %p2962_p9, %p2959_p8 }
  0x1b   :  { %2967 = shalt.err (!%p2964_p10)
}
  0x1c   :  { %s2968_s1 = scalar_lea.vmem %s23_s16, 128  ;;  %p2973_p12 = scmp.lt.s32.totalorder %s23_s16, %s23_s16 }
  0x1d   :  { %p2969_p11 = scmp.ne.s32.totalorder %s23_s16, %s2968_s1  ;;  %p2974_p13 = scmp.lt.s32.totalorder %s2968_s1, %s2968_s1 }
  0x1f   :  { %p2975_p0 = por %p2974_p13, %p2973_p12 }
  0x21   :  { %p2976_p1 = pnand %p2975_p0, %p2969_p11 }
  0x23   :  { %2979 = shalt.err (!%p2976_p1)
}
  0x24   :  { %25 = dma.hbm_to_vmem [thread:$0]  %s3739_s0, 128, %s23_s16, [#allocation3]  }
  0x25   :  { %s2980_s30 = scalar_lea.hbm %s3742_s3, 2048 }
  0x26   :  { %p2981_p2 = scmp.ne.s32.totalorder %s3742_s3, %s2980_s30  ;;  %p2984_p3 = scmp.lt.u32.totalorder %s2980_s30, %s3742_s3 }
  0x28   :  { %p2986_p4 = pnand %p2984_p3, %p2981_p2 }
  0x2a   :  { %2989 = shalt.err (!%p2986_p4)
}
  0x2b   :  { %s2990_s14 = scalar_lea.vmem %s46_s18, 2048  ;;  %p2995_p6 = scmp.lt.s32.totalorder %s46_s18, %s46_s18 }
  0x2c   :  { %p2991_p5 = scmp.ne.s32.totalorder %s46_s18, %s2990_s14  ;;  %p2996_p7 = scmp.lt.s32.totalorder %s2990_s14, %s2990_s14 }
  0x2e   :  { %p2997_p8 = por %p2996_p7, %p2995_p6 }
  0x30   :  { %p2998_p9 = pnand %p2997_p8, %p2991_p5 }
  0x32   :  { %3001 = shalt.err (!%p2998_p9)
}
  0x33   :  { %51 = dma.hbm_to_vmem [thread:$0]  %s3742_s3, 2048, %s46_s18, [#allocation6], %s3055_s11, %s3055_s11, %s3056_s12  }
  0x34   :  { %s3059_s16 = smov [#allocation8]   ;;  %s3002_s21 = scalar_lea.hbm %s3744_s5, 2048 }
  0x35   :  { %s59_s17 = sshll.u32 %s3059_s16, 4  ;;  %p3003_p10 = scmp.ne.s32.totalorder %s3744_s5, %s3002_s21  ;;  %s60_s17 = int_to_ptr.vmem [resolvable:$true] %s59_s17 }
  0x36   :  { %p3006_p11 = scmp.lt.u32.totalorder %s3002_s21, %s3744_s5 }
  0x38   :  { %p3008_p12 = pnand %p3006_p11, %p3003_p10 }
  0x3a   :  { %3011 = shalt.err (!%p3008_p12)
}
  0x3b   :  { %s3012_s1 = scalar_lea.vmem %s60_s17, 2048  ;;  %p3017_p0 = scmp.lt.s32.totalorder %s60_s17, %s60_s17 }
  0x3c   :  { %p3013_p13 = scmp.ne.s32.totalorder %s60_s17, %s3012_s1  ;;  %p3018_p1 = scmp.lt.s32.totalorder %s3012_s1, %s3012_s1 }
  0x3e   :  { %p3019_p2 = por %p3018_p1, %p3017_p0 }
  0x40   :  { %p3020_p3 = pnand %p3019_p2, %p3013_p13 }
  0x42   :  { %3023 = shalt.err (!%p3020_p3)
}
  0x43   :  { %65 = dma.hbm_to_vmem [thread:$0]  %s3744_s5, 2048, %s60_s17, [#allocation9], %s3055_s11, %s3055_s11, %s3056_s12  }
  0x44   :  { %3046 = dma.done.wait [#allocation3], 128  }
  0x45   :  { %3047 = vsyncadd [#allocation3], 4294967168 }
  0x46   :  { %3048 = dma.done.wait [#allocation6], 2304  }
  0x47   :  { %3049 = vsyncadd [#allocation6], 4294964992 }
  0x48   :  { %3050 = dma.done.wait [#allocation9], 2048  }
  0x49   :  { %3051 = vsyncadd [#allocation9], 4294965248  ;;  %v3060_v0 = vmov 0.0|0.0   ;;  %vm3061_vm0 = vmmov 0   ;;  %v3062_v1 = vmov 0.0   ;;  %vm90_vm1 = vcmask 130048  }
  0x4a   :  { %2597 = vmatprep.subr.bf16.mxu0 %v3060_v0  ;;  %2151 = vmatprep.mubr.msk.f32.mxu0 %vm3061_vm0, %v3062_v1  ;;  %v81_v2 = vld [vmem:[#allocation5] sm:$0xff]  ;;  %v82_v3 = vld [vmem:[#allocation5 + $0x8] sm:$0xff]  ;;  %v80_v4 = vld [vmem:[#allocation2] sm:$0xff]  ;;  %s3063_s27 = smov [#allocation10]  }
  0x4b   :  { %2588 = vmatprep.subr.bf16.mxu1 %v3060_v0  ;;  %2130 = vmatprep.mubr.msk.f32.mxu1 %vm3061_vm0, %v3062_v1  ;;  %v95_v5 = vand.u32 4294901760, %v81_v2  ;;  %v98_v6 = vand.u32 4294901760, %v82_v3  ;;  %v92_v7 = vsel %vm90_vm1, %v80_v4, 0  ;;  %v554_v8 = vld [vmem:[#allocation7] sm:$0xff]  ;;  %v555_v9 = vld [vmem:[#allocation7 + $0x8] sm:$0xff]  ;;  %v556_v10 = vld [vmem:[#allocation7 + $0x10] sm:$0xff] }
  0x4c   :  { %v161_v11 = vand.u32 4294901760, %v92_v7  ;;  %v578_v12 = vand.u32 4294901760, %v554_v8  ;;  %v581_v13 = vand.u32 4294901760, %v555_v9  ;;  %v557_v14 = vld [vmem:[#allocation7 + $0x18] sm:$0xff]  ;;  %v584_v18 = vand.u32 4294901760, %v556_v10  ;;  %v558_v19 = vld [vmem:[#allocation7 + $0x20] sm:$0xff] }
  0x4d   :  { %v2589_v15 = vpack.c.bf16 %v98_v6, %v95_v5  ;;  %v173_v16 = vsub.f32 %v81_v2, %v95_v5  ;;  %v180_v17 = vsub.f32 %v82_v3, %v98_v6  ;;  %v587_v23 = vand.u32 4294901760, %v557_v14  ;;  %v559_v24 = vld [vmem:[#allocation7 + $0x28] sm:$0xff]  ;;  %v560_v46 = vld [vmem:[#allocation7 + $0x30] sm:$0xff]  ;;  %v561_v47 = vld [vmem:[#allocation7 + $0x38] sm:$0xff]  ;;  %s1890_s28 = sshll.u32 %s3063_s27, 4  ;;  %s1891_s28 = int_to_ptr.vmem [resolvable:$true] %s1890_s28 }
  0x4e   :  { %v162_v20 = vsub.f32 %v92_v7, %v161_v11  ;;  %v3167_v21 = vsub.f32 %v554_v8, %v578_v12  ;;  %v3169_v22 = vsub.f32 %v555_v9, %v581_v13  ;;  %v3173_v28 = vsub.f32 %v556_v10, %v584_v18  ;;  %v562_v51 = vld [vmem:[#allocation7 + $0x40] sm:$0xff]  ;;  %v563_v52 = vld [vmem:[#allocation7 + $0x48] sm:$0xff]  ;;  %v564_v58 = vld [vmem:[#allocation7 + $0x50] sm:$0xff]  ;;  %s3024_s29 = scalar_lea.vmem %s1891_s28, 128  ;;  %p3029_p5 = scmp.lt.s32.totalorder %s1891_s28, %s1891_s28 }
  0x4f   :  { %2599 = vmatpush3.bf16.msra.mxu0 %v2589_v15  ;;  %2590 = vmatpush3.bf16.msra.mxu1 %v2589_v15  ;;  %v174_v25 = vand.u32 4294901760, %v173_v16  ;;  %v181_v26 = vand.u32 4294901760, %v180_v17  ;;  %v3175_v29 = vsub.f32 %v557_v14, %v587_v23  ;;  %v590_v30 = vand.u32 4294901760, %v558_v19  ;;  %v565_v59 = vld [vmem:[#allocation7 + $0x58] sm:$0xff]  ;;  %v566_v63 = vld [vmem:[#allocation7 + $0x60] sm:$0xff]  ;;  %v567_v2 = vld [vmem:[#allocation7 + $0x68] sm:$0xff]  ;;  %p3025_p4 = scmp.ne.s32.totalorder %s1891_s28, %s3024_s29  ;;  %p3030_p6 = scmp.lt.s32.totalorder %s3024_s29, %s3024_s29 }
  0x50   :  { %v163_v27 = vand.u32 4294901760, %v162_v20  ;;  %2591 = vmatprep.subr.bf16.mxu1 %v3060_v0  ;;  %2600 = vmatprep.subr.bf16.mxu0 %v3060_v0  ;;  %v593_v34 = vand.u32 4294901760, %v559_v24  ;;  %v2595_v42 = vpack.c.bf16 %v180_v17, %v173_v16  ;;  %v3193_v43 = vpack.c.bf16 %v581_v13, %v578_v12  ;;  %v568_v6 = vld [vmem:[#allocation7 + $0x70] sm:$0xff]  ;;  %v569_v7 = vld [vmem:[#allocation7 + $0x78] sm:$0xff] }
  0x51   :  { %v175_v31 = vsub.f32 %v173_v16, %v174_v25  ;;  %v182_v32 = vsub.f32 %v180_v17, %v181_v26  ;;  %v2601_v33 = vpack.c.bf16 %v181_v26, %v174_v25  ;;  %v3177_v36 = vsub.f32 %v558_v19, %v590_v30  ;;  %p3031_p7 = por %p3030_p6, %p3029_p5 }
  0x52   :  { %2152 = vmatmul.mubr.f32.vlgmr.msra.gmra.mrb[0].mxu0 %v163_v27  ;;  %v164_v35 = vsub.f32 %v162_v20, %v163_v27  ;;  %v3181_v39 = vsub.f32 %v559_v24, %v593_v34  ;;  %v3198_v44 = vpack.c.bf16 %v587_v23, %v584_v18  ;;  %v3204_v45 = vpack.c.bf16 %v593_v34, %v590_v30 }
  0x53   :  { %v176_v37 = vand.u32 4294901760, %v175_v31  ;;  %v183_v38 = vand.u32 4294901760, %v182_v32  ;;  %2602 = vmatpush3.bf16.msra.mxu0 %v2601_v33  ;;  %2158 = vmatprep.mubr.msk.f32.mxu0 %vm3061_vm0, %v3062_v1  ;;  %v596_v48 = vand.u32 4294901760, %v560_v46  ;;  %v599_v49 = vand.u32 4294901760, %v561_v47  ;;  %p3032_p8 = pnand %p3031_p7, %p3025_p4 }
  0x54   :  { %v165_v40 = vand.u32 4294901760, %v164_v35  ;;  %2603 = vmatprep.subr.bf16.mxu0 %v3060_v0  ;;  %v602_v55 = vand.u32 4294901760, %v562_v51  ;;  %v605_v56 = vand.u32 4294901760, %v563_v52  ;;  %v608_v60 = vand.u32 4294901760, %v564_v58 }
  0x55   :  { %v2592_v41 = vpack.c.bf16 %v183_v38, %v176_v37  ;;  %v3209_v50 = vpack.c.bf16 %v599_v49, %v596_v48  ;;  %v3212_v53 = vsub.f32 %v560_v46, %v596_v48  ;;  %v3214_v54 = vsub.f32 %v561_v47, %v599_v49 }
  0x56   :  { %2131 = vmatmul.mubr.f32.vlgmr.msra.gmra.mrb[0].mxu1 %v165_v40  ;;  %v3217_v57 = vpack.c.bf16 %v605_v56, %v602_v55  ;;  %v611_v61 = vand.u32 4294901760, %v565_v59  ;;  %v614_v3 = vand.u32 4294901760, %v566_v63  ;;  %v617_v4 = vand.u32 4294901760, %v567_v2 }
  0x57   :  { %2593 = vmatpush3.bf16.msra.mxu1 %v2592_v41  ;;  %2137 = vmatprep.mubr.msk.f32.mxu1 %vm3061_vm0, %v3062_v1  ;;  %v620_v8 = vand.u32 4294901760, %v568_v6  ;;  %v623_v9 = vand.u32 4294901760, %v569_v7  ;;  %v671_v10 = vand.u32 4294901760, %v3167_v21  ;;  %v3231_v12 = vsub.f32 %v562_v51, %v602_v55 }
  0x58   :  { %2594 = vmatprep.subr.bf16.mxu1 %v3060_v0  ;;  %v3221_v62 = vpack.c.bf16 %v611_v61, %v608_v60  ;;  %v3225_v5 = vpack.c.bf16 %v617_v4, %v614_v3  ;;  %v3233_v13 = vsub.f32 %v563_v52, %v605_v56  ;;  %v3235_v14 = vsub.f32 %v564_v58, %v608_v60 }
  0x59   :  { %v3239_v16 = vsub.f32 %v566_v63, %v614_v3  ;;  %v3241_v17 = vsub.f32 %v567_v2, %v617_v4  ;;  %v3243_v18 = vpack.c.bf16 %v623_v9, %v620_v8  ;;  %v3245_v19 = vsub.f32 %v568_v6, %v620_v8 }
  0x5a   :  { %2159 = vmatmul.mubr.f32.vlgmr.msra.gmra.mrb[0].mxu0 %v161_v11  ;;  %v672_v23 = vsub.f32 %v3167_v21, %v671_v10  ;;  %v685_v25 = vand.u32 4294901760, %v3173_v28  ;;  %v692_v26 = vand.u32 4294901760, %v3175_v29  ;;  %v3758_v37 = vand.u32 4294901760, %v3177_v36 }
  0x5b   :  { %2605 = vmatpush3.bf16.msra.mxu0 %v2589_v15  ;;  %2165 = vmatprep.mubr.msk.f32.mxu0 %vm3061_vm0, %v3062_v1  ;;  %v3237_v15 = vsub.f32 %v565_v59, %v611_v61  ;;  %v3757_v38 = vand.u32 4294901760, %v3181_v39  ;;  %v3756_v48 = vand.u32 4294901760, %v3212_v53  ;;  %v3755_v49 = vand.u32 4294901760, %v3214_v54 }
  0x5c   :  { %2750 = vmatprep.subr.bf16.mxu0 %v3060_v0  ;;  %v673_v27 = vand.u32 4294901760, %v672_v23  ;;  %v686_v31 = vsub.f32 %v3173_v28, %v685_v25  ;;  %v693_v32 = vsub.f32 %v3175_v29, %v692_v26  ;;  %v700_v41 = vsub.f32 %v3177_v36, %v3758_v37 }
  0x5d   :  { %v714_v52 = vsub.f32 %v3212_v53, %v3756_v48  ;;  %v721_v55 = vsub.f32 %v3214_v54, %v3755_v49  ;;  %v3754_v59 = vand.u32 4294901760, %v3231_v12  ;;  %v3753_v60 = vand.u32 4294901760, %v3233_v13 }
  0x5e   :  { %2138 = vmatmul.mubr.f32.vlgmr.msra.gmra.mrb[0].mxu1 %v161_v11  ;;  %v687_v34 = vand.u32 4294901760, %v686_v31  ;;  %v694_v35 = vand.u32 4294901760, %v693_v32  ;;  %v701_v46 = vand.u32 4294901760, %v700_v41  ;;  %v3752_v6 = vand.u32 4294901760, %v3235_v14 }
  0x5f   :  { %2596 = vmatpush3.bf16.msra.mxu1 %v2595_v42  ;;  %2144 = vmatprep.mubr.msk.f32.mxu1 %vm3061_vm0, %v3062_v1  ;;  %v707_v42 = vsub.f32 %v3181_v39, %v3757_v38  ;;  %v715_v56 = vand.u32 4294901760, %v714_v52  ;;  %v722_v58 = vand.u32 4294901760, %v721_v55  ;;  %v728_v63 = vsub.f32 %v3231_v12, %v3754_v59  ;;  %v1228_v59 = vld [vmem:[#allocation8 + $0x48] sm:$0xff] }
  0x60   :  { %2606 = vmatprep.subr.bf16.mxu1 %v3060_v0  ;;  %v3269_v40 = vpack.c.bf16 %v694_v35, %v687_v34  ;;  %v735_v2 = vsub.f32 %v3233_v13, %v3753_v60  ;;  %v3749_v31 = vand.u32 4294901760, %v3241_v17 }
  0x61   :  { %v708_v47 = vand.u32 4294901760, %v707_v42  ;;  %v2640_v61 = vpack.c.bf16 %v722_v58, %v715_v56  ;;  %v729_v3 = vand.u32 4294901760, %v728_v63 }
  0x62   :  { %2166 = vmatmul.mubr.f32.vlgmr.msra.gmra.mrb[0].mxu0 %v161_v11  ;;  %v678_v11 = vand.u32 4294901760, %v3169_v22  ;;  %v736_v4 = vand.u32 4294901760, %v735_v2  ;;  %v763_v35 = vsub.f32 %v3241_v17, %v3749_v31 }
  0x63   :  { %2410 = vmatprep.mubr.msk.f32.mxu0 %vm3061_vm0, %v3062_v1  ;;  %v2637_v51 = vpack.c.bf16 %v708_v47, %v701_v46  ;;  %v3748_v46 = vand.u32 4294901760, %v3245_v19 }
  0x64   :  { %v679_v24 = vsub.f32 %v3169_v22, %v678_v11  ;;  %v2643_v8 = vpack.c.bf16 %v736_v4, %v729_v3  ;;  %v764_v42 = vand.u32 4294901760, %v763_v35  ;;  %v2655_v3 = vpack.c.bf16 %v3169_v22, %v3167_v21 }
  0x65   :  { %v770_v55 = vsub.f32 %v3245_v19, %v3748_v46  ;;  %v2658_v4 = vpack.c.bf16 %v3175_v29, %v3173_v28  ;;  %v3763_v21 = vand.u32 4294901760, %v3177_v36  ;;  %v3764_v22 = vand.u32 4294901760, %v3181_v39 }
  0x66   :  { %2145 = vmatmul.mubr.f32.vlgmr.msra.gmra.mrb[0].mxu1 %v162_v20  ;;  %v3247_v20 = vsub.f32 %v569_v7, %v623_v9  ;;  %v680_v30 = vand.u32 4294901760, %v679_v24  ;;  %v3751_v7 = vand.u32 4294901760, %v3237_v15  ;;  %v742_v9 = vsub.f32 %v3235_v14, %v3752_v6 }
  0x67   :  { %2608 = vmatpush3.bf16.msra.mxu1 %v3193_v43  ;;  %2200 = vmatprep.mubr.msk.f32.mxu1 %vm3061_vm0, %v3062_v1  ;;  %v771_v58 = vand.u32 4294901760, %v770_v55  ;;  %v1901_v55 = vld [vmem:[%s3741_s2] ss:$0 sm:$0xff]  ;;  %v3766_v28 = vand.u32 4294901760, %v3214_v54 }
  0x68   :  { %2609 = vmatprep.subr.bf16.mxu1 %v3060_v0  ;;  %v3265_v33 = vpack.c.bf16 %v680_v30, %v673_v27  ;;  %v749_v23 = vsub.f32 %v3237_v15, %v3751_v7  ;;  %v743_v24 = vand.u32 4294901760, %v742_v9  ;;  %v3750_v30 = vand.u32 4294901760, %v3239_v16 }
  0x69   :  { %v3747_v47 = vand.u32 4294901760, %v3247_v20  ;;  %v2661_v9 = vpack.c.bf16 %v3181_v39, %v3177_v36  ;;  %v2676_v35 = vpack.c.bf16 %v3247_v20, %v3245_v19  ;;  %v3769_v36 = vand.u32 4294901760, %v3235_v14 }
  0x6a   :  { %v750_v27 = vand.u32 4294901760, %v749_v23  ;;  %v756_v34 = vsub.f32 %v3239_v16, %v3750_v30  ;;  %v2664_v23 = vpack.c.bf16 %v3214_v54, %v3212_v53  ;;  %v3770_v39 = vand.u32 4294901760, %v3237_v15 }
  0x6b   :  { %2611 = vmatpush3.bf16.msra.mxu1 %v3198_v44  ;;  %v777_v56 = vsub.f32 %v3247_v20, %v3747_v47  ;;  %v3772_v54 = vand.u32 4294901760, %v3241_v17 }
  0x6c   :  { %2612 = vmatprep.subr.bf16.mxu1 %v3060_v0  ;;  %v2646_v32 = vpack.c.bf16 %v750_v27, %v743_v24  ;;  %v757_v41 = vand.u32 4294901760, %v756_v34  ;;  %v2667_v24 = vpack.c.bf16 %v3233_v13, %v3231_v12  ;;  %v2670_v27 = vpack.c.bf16 %v3237_v15, %v3235_v14  ;;  %v1232_v15 = vld [vmem:[#allocation8 + $0x68] sm:$0xff] }
  0x6d   :  { %v778_v63 = vand.u32 4294901760, %v777_v56  ;;  %v2673_v34 = vpack.c.bf16 %v3241_v17, %v3239_v16  ;;  %v1233_v17 = vld [vmem:[#allocation8 + $0x70] sm:$0xff] }
  0x6e   :  { %v2649_v52 = vpack.c.bf16 %v764_v42, %v757_v41 }
  0x6f   :  { %2614 = vmatpush3.bf16.msra.mxu1 %v3204_v45  ;;  %v2652_v2 = vpack.c.bf16 %v778_v63, %v771_v58 }
  0x70   :  { %2615 = vmatprep.subr.bf16.mxu1 %v3060_v0 }
  0x73   :  { %2617 = vmatpush3.bf16.msra.mxu1 %v3209_v50 }
  0x74   :  { %2618 = vmatprep.subr.bf16.mxu1 %v3060_v0 }
  0x77   :  { %2620 = vmatpush3.bf16.msra.mxu1 %v3217_v57 }
  0x78   :  { %2621 = vmatprep.subr.bf16.mxu1 %v3060_v0 }
  0x7b   :  { %2623 = vmatpush3.bf16.msra.mxu1 %v3221_v62 }
  0x7c   :  { %2624 = vmatprep.subr.bf16.mxu1 %v3060_v0 }
  0x7f   :  { %2626 = vmatpush3.bf16.msra.mxu1 %v3225_v5 }
  0x80   :  { %2627 = vmatprep.subr.bf16.mxu1 %v3060_v0 }
  0x83   :  { %2629 = vmatpush3.bf16.msra.mxu1 %v3243_v18 }
  0x84   :  { %2630 = vmatprep.subr.bf16.mxu1 %v3060_v0 }
 0x135   :  { %v549_v41 = vpop.f32.mrb[0].mxu0 }
 0x136   :  { %v2167_v42 = vpop.f32.mrb[1].mxu0 }
 0x139   :  { %v324_v56 = vpop.f32.mrb[0].mxu1 }
 0x13a   :  { %v2894_v58 = vadd.f32 %v1901_v55, %v324_v56  ;;  %v2146_v63 = vpop.f32.mrb[1].mxu1  ;;  %v1225_v55 = vld [vmem:[#allocation8 + $0x30] sm:$0xff]  ;;  %v1226_v56 = vld [vmem:[#allocation8 + $0x38] sm:$0xff] }
 0x13c   :  { %v2895_v47 = vadd.f32 %v2894_v58, %v549_v41  ;;  %v1227_v58 = vld [vmem:[#allocation8 + $0x40] sm:$0xff] }
 0x13e   :  { %v553_v46 = vmax.f32 %v2895_v47, 0.0  ;;  %v1224_v47 = vld [vmem:[#allocation8 + $0x28] sm:$0xff] }
 0x13f   :  { %v1258_v41 = vand.u32 4294901760, %v1224_v47 }
 0x140   :  { %v3336_v31 = vand.u32 4294901760, %v553_v46 }
 0x141   :  { %v3379_v37 = vsub.f32 %v1224_v47, %v1258_v41 }
 0x142   :  { %v3339_v30 = vsub.f32 %v553_v46, %v3336_v31  ;;  %v1223_v46 = vld [vmem:[#allocation8 + $0x20] sm:$0xff] }
 0x144   :  { %v660_v7 = vand.u32 4294901760, %v3339_v30 }
 0x146   :  { %v661_v42 = vsub.f32 %v3339_v30, %v660_v7 }
 0x148   :  { %v662_v6 = vand.u32 4294901760, %v661_v42 }
 0x14a   :  { %2201 = vmatmul.mubr.f32.vlgmr.msra.gmra.mrb[2].mxu1 %v662_v6 }
 0x14b   :  { %2632 = vmatpush3.bf16.msra.mxu1 %v3265_v33  ;;  %2235 = vmatprep.mubr.msk.f32.mxu1 %vm3061_vm0, %v3062_v1  ;;  %v1219_v33 = vld [vmem:[#allocation8] sm:$0xff] }
 0x14c   :  { %2633 = vmatprep.subr.bf16.mxu1 %v3060_v0 }
 0x14f   :  { %2635 = vmatpush3.bf16.msra.mxu1 %v3269_v40  ;;  %v1220_v40 = vld [vmem:[#allocation8 + $0x8] sm:$0xff] }
 0x150   :  { %2636 = vmatprep.subr.bf16.mxu1 %v3060_v0  ;;  %v1246_v6 = vand.u32 4294901760, %v1220_v40 }
 0x152   :  { %v3365_v42 = vsub.f32 %v1220_v40, %v1246_v6  ;;  %v1264_v40 = vand.u32 4294901760, %v1226_v56 }
 0x153   :  { %2638 = vmatpush3.bf16.msra.mxu1 %v2637_v51  ;;  %v1221_v51 = vld [vmem:[#allocation8 + $0x10] sm:$0xff] }
 0x154   :  { %2639 = vmatprep.subr.bf16.mxu1 %v3060_v0 }
 0x157   :  { %2641 = vmatpush3.bf16.msra.mxu1 %v2640_v61  ;;  %v1243_v61 = vand.u32 4294901760, %v1219_v33 }
 0x158   :  { %2642 = vmatprep.subr.bf16.mxu1 %v3060_v0 }
 0x159   :  { %v3361_v63 = vpack.c.bf16 %v1246_v6, %v1243_v61 }
 0x15b   :  { %2644 = vmatpush3.bf16.msra.mxu1 %v2643_v8  ;;  %v1222_v8 = vld [vmem:[#allocation8 + $0x18] sm:$0xff]  ;;  %2752 = vmatpush3.bf16.msra.mxu0 %v3361_v63 }
 0x15c   :  { %2645 = vmatprep.subr.bf16.mxu1 %v3060_v0  ;;  %2753 = vmatprep.subr.bf16.mxu0 %v3060_v0 }
 0x15f   :  { %2647 = vmatpush3.bf16.msra.mxu1 %v2646_v32  ;;  %v1249_v32 = vand.u32 4294901760, %v1221_v51 }
 0x160   :  { %2648 = vmatprep.subr.bf16.mxu1 %v3060_v0 }
 0x161   :  { %v3367_v60 = vsub.f32 %v1221_v51, %v1249_v32  ;;  %v1270_v51 = vand.u32 4294901760, %v1228_v59 }
 0x163   :  { %2650 = vmatpush3.bf16.msra.mxu1 %v2649_v52  ;;  %v1252_v52 = vand.u32 4294901760, %v1222_v8 }
 0x164   :  { %2651 = vmatprep.subr.bf16.mxu1 %v3060_v0 }
 0x165   :  { %v3369_v49 = vpack.c.bf16 %v1252_v52, %v1249_v32  ;;  %v3371_v48 = vsub.f32 %v1222_v8, %v1252_v52  ;;  %v3385_v8 = vsub.f32 %v1226_v56, %v1264_v40 }
 0x167   :  { %2653 = vmatpush3.bf16.msra.mxu1 %v2652_v2  ;;  %v1255_v2 = vand.u32 4294901760, %v1223_v46  ;;  %2755 = vmatpush3.bf16.msra.mxu0 %v3369_v49 }
 0x168   :  { %2654 = vmatprep.subr.bf16.mxu1 %v3060_v0  ;;  %2756 = vmatprep.subr.bf16.mxu0 %v3060_v0 }
 0x169   :  { %v3373_v38 = vsub.f32 %v1223_v46, %v1255_v2  ;;  %v3389_v46 = vsub.f32 %v1228_v59, %v1270_v51 }
 0x16a   :  { %2236 = vmatmul.mubr.f32.vlgmr.msra.gmra.mrb[2].mxu1 %v3336_v31 }
 0x16b   :  { %2656 = vmatpush3.bf16.msra.mxu1 %v2655_v3  ;;  %2270 = vmatprep.mubr.msk.f32.mxu1 %vm3061_vm0, %v3062_v1  ;;  %v3363_v3 = vsub.f32 %v1219_v33, %v1243_v61  ;;  %v1261_v33 = vand.u32 4294901760, %v1225_v55  ;;  %v1267_v61 = vand.u32 4294901760, %v1227_v58 }
 0x16c   :  { %2657 = vmatprep.subr.bf16.mxu1 %v3060_v0 }
 0x16d   :  { %v3383_v6 = vsub.f32 %v1225_v55, %v1261_v33  ;;  %v3387_v32 = vsub.f32 %v1227_v58, %v1267_v61  ;;  %v3403_v59 = vpack.c.bf16 %v1264_v40, %v1261_v33 }
 0x16f   :  { %2659 = vmatpush3.bf16.msra.mxu1 %v2658_v4  ;;  %v3395_v4 = vpack.c.bf16 %v1258_v41, %v1255_v2 }
 0x170   :  { %2660 = vmatprep.subr.bf16.mxu1 %v3060_v0 }
 0x171   :  { %2758 = vmatpush3.bf16.msra.mxu0 %v3395_v4 }
 0x172   :  { %2759 = vmatprep.subr.bf16.mxu0 %v3060_v0 }
 0x173   :  { %2662 = vmatpush3.bf16.msra.mxu1 %v2661_v9  ;;  %v3411_v9 = vpack.c.bf16 %v1270_v51, %v1267_v61 }
 0x174   :  { %2663 = vmatprep.subr.bf16.mxu1 %v3060_v0 }
 0x175   :  { %2761 = vmatpush3.bf16.msra.mxu0 %v3403_v59 }
 0x176   :  { %2762 = vmatprep.subr.bf16.mxu0 %v3060_v0 }
 0x177   :  { %2665 = vmatpush3.bf16.msra.mxu1 %v2664_v23  ;;  %v2703_v23 = vpack.c.bf16 %v678_v11, %v671_v10  ;;  %v2709_v10 = vpack.c.bf16 %v3764_v22, %v3763_v21  ;;  %v3765_v11 = vand.u32 4294901760, %v3212_v53  ;;  %v3771_v53 = vand.u32 4294901760, %v3239_v16 }
 0x178   :  { %2666 = vmatprep.subr.bf16.mxu1 %v3060_v0  ;;  %v1282_v16 = vand.u32 4294901760, %v1232_v15 }
 0x179   :  { %2764 = vmatpush3.bf16.msra.mxu0 %v3411_v9  ;;  %v2712_v29 = vpack.c.bf16 %v3766_v28, %v3765_v11  ;;  %v1364_v11 = vand.u32 4294901760, %v3373_v38  ;;  %v1371_v28 = vand.u32 4294901760, %v3379_v37 }
 0x17a   :  { %2765 = vmatprep.subr.bf16.mxu0 %v3060_v0  ;;  %v3535_v58 = vsub.f32 %v1232_v15, %v1282_v16 }
 0x17b   :  { %2668 = vmatpush3.bf16.msra.mxu1 %v2667_v24  ;;  %v2706_v24 = vpack.c.bf16 %v692_v26, %v685_v25  ;;  %v3767_v25 = vand.u32 4294901760, %v3231_v12  ;;  %v3768_v26 = vand.u32 4294901760, %v3233_v13  ;;  %v3773_v12 = vand.u32 4294901760, %v3245_v19 }
 0x17c   :  { %2669 = vmatprep.subr.bf16.mxu1 %v3060_v0  ;;  %v3774_v13 = vand.u32 4294901760, %v3247_v20  ;;  %v1285_v19 = vand.u32 4294901760, %v1233_v17 }
 0x17e   :  { %v3538_v33 = vsub.f32 %v1233_v17, %v1285_v19 }
 0x17f   :  { %2671 = vmatpush3.bf16.msra.mxu1 %v2670_v27  ;;  %v2721_v27 = vpack.c.bf16 %v3772_v54, %v3771_v53  ;;  %v1378_v53 = vand.u32 4294901760, %v3383_v6  ;;  %v1385_v54 = vand.u32 4294901760, %v3385_v8 }
 0x180   :  { %2672 = vmatprep.subr.bf16.mxu1 %v3060_v0 }
 0x183   :  { %2674 = vmatpush3.bf16.msra.mxu1 %v2673_v34  ;;  %v2724_v34 = vpack.c.bf16 %v3774_v13, %v3773_v12  ;;  %v1379_v12 = vsub.f32 %v3383_v6, %v1378_v53  ;;  %v1386_v13 = vsub.f32 %v3385_v8, %v1385_v54 }
 0x184   :  { %2675 = vmatprep.subr.bf16.mxu1 %v3060_v0 }
 0x187   :  { %2677 = vmatpush3.bf16.msra.mxu1 %v2676_v35  ;;  %v1343_v35 = vand.u32 4294901760, %v3365_v42 }
 0x188   :  { %2678 = vmatprep.subr.bf16.mxu1 %v3060_v0 }
 0x189   :  { %v1344_v2 = vsub.f32 %v3365_v42, %v1343_v35 }
 0x18a   :  { %2271 = vmatmul.mubr.f32.vlgmr.msra.gmra.mrb[2].mxu1 %v3339_v30  ;;  %v2718_v30 = vpack.c.bf16 %v3770_v39, %v3769_v36 }
 0x18b   :  { %2680 = vmatpush3.bf16.msra.mxu1 %v3193_v43  ;;  %2305 = vmatprep.mubr.msk.f32.mxu1 %vm3061_vm0, %v3062_v1  ;;  %v1345_v51 = vand.u32 4294901760, %v1344_v2 }
 0x18c   :  { %2681 = vmatprep.subr.bf16.mxu1 %v3060_v0 }
 0x18f   :  { %2683 = vmatpush3.bf16.msra.mxu1 %v3198_v44 }
 0x190   :  { %2684 = vmatprep.subr.bf16.mxu1 %v3060_v0 }
 0x193   :  { %2686 = vmatpush3.bf16.msra.mxu1 %v3204_v45 }
 0x194   :  { %2687 = vmatprep.subr.bf16.mxu1 %v3060_v0 }
 0x197   :  { %2689 = vmatpush3.bf16.msra.mxu1 %v3209_v50 }
 0x198   :  { %2690 = vmatprep.subr.bf16.mxu1 %v3060_v0 }
 0x19b   :  { %2692 = vmatpush3.bf16.msra.mxu1 %v3217_v57 }
 0x19c   :  { %2693 = vmatprep.subr.bf16.mxu1 %v3060_v0 }
 0x19f   :  { %2695 = vmatpush3.bf16.msra.mxu1 %v3221_v62 }
 0x1a0   :  { %2696 = vmatprep.subr.bf16.mxu1 %v3060_v0 }
 0x1a3   :  { %2698 = vmatpush3.bf16.msra.mxu1 %v3225_v5 }
 0x1a4   :  { %2699 = vmatprep.subr.bf16.mxu1 %v3060_v0 }
 0x1a7   :  { %2701 = vmatpush3.bf16.msra.mxu1 %v3243_v18 }
 0x1a8   :  { %2702 = vmatprep.subr.bf16.mxu1 %v3060_v0 }
 0x1aa   :  { %2306 = vmatmul.mubr.f32.vlgmr.msra.gmra.mrb[2].mxu1 %v660_v7  ;;  %v2715_v7 = vpack.c.bf16 %v3768_v26, %v3767_v25  ;;  %v1365_v26 = vsub.f32 %v3373_v38, %v1364_v11 }
 0x1ab   :  { %2704 = vmatpush3.bf16.msra.mxu1 %v2703_v23  ;;  %2340 = vmatprep.mubr.msk.f32.mxu1 %vm3061_vm0, %v3062_v1  ;;  %v1350_v23 = vand.u32 4294901760, %v3367_v60 }
 0x1ac   :  { %2705 = vmatprep.subr.bf16.mxu1 %v3060_v0  ;;  %v1366_v39 = vand.u32 4294901760, %v1365_v26 }
 0x1ad   :  { %v1351_v22 = vsub.f32 %v3367_v60, %v1350_v23 }
 0x1af   :  { %2707 = vmatpush3.bf16.msra.mxu1 %v2706_v24  ;;  %v1357_v24 = vand.u32 4294901760, %v3371_v48 }
 0x1b0   :  { %2708 = vmatprep.subr.bf16.mxu1 %v3060_v0 }
 0x1b3   :  { %2710 = vmatpush3.bf16.msra.mxu1 %v2709_v10  ;;  %v1358_v10 = vsub.f32 %v3371_v48, %v1357_v24 }
 0x1b4   :  { %2711 = vmatprep.subr.bf16.mxu1 %v3060_v0 }
 0x1b5   :  { %v1359_v25 = vand.u32 4294901760, %v1358_v10 }
 0x1b7   :  { %2713 = vmatpush3.bf16.msra.mxu1 %v2712_v29  ;;  %v1352_v29 = vand.u32 4294901760, %v1351_v22  ;;  %v3761_v22 = vand.u32 4294901760, %v3535_v58 }
 0x1b8   :  { %2714 = vmatprep.subr.bf16.mxu1 %v3060_v0 }
 0x1b9   :  { %v2778_v36 = vpack.c.bf16 %v1359_v25, %v1352_v29  ;;  %v1428_v25 = vsub.f32 %v3535_v58, %v3761_v22 }
 0x1bb   :  { %2716 = vmatpush3.bf16.msra.mxu1 %v2715_v7  ;;  %v1372_v7 = vsub.f32 %v3379_v37, %v1371_v28 }
 0x1bc   :  { %2717 = vmatprep.subr.bf16.mxu1 %v3060_v0 }
 0x1bf   :  { %2719 = vmatpush3.bf16.msra.mxu1 %v2718_v30  ;;  %v1373_v30 = vand.u32 4294901760, %v1372_v7  ;;  %v1429_v7 = vand.u32 4294901760, %v1428_v25 }
 0x1c0   :  { %2720 = vmatprep.subr.bf16.mxu1 %v3060_v0 }
 0x1c3   :  { %2722 = vmatpush3.bf16.msra.mxu1 %v2721_v27  ;;  %v2781_v27 = vpack.c.bf16 %v1373_v30, %v1366_v39  ;;  %v3760_v39 = vand.u32 4294901760, %v3538_v33 }
 0x1c4   :  { %2723 = vmatprep.subr.bf16.mxu1 %v3060_v0 }
 0x1c7   :  { %2725 = vmatpush3.bf16.msra.mxu1 %v2724_v34  ;;  %v1380_v34 = vand.u32 4294901760, %v1379_v12 }
 0x1c8   :  { %2726 = vmatprep.subr.bf16.mxu1 %v3060_v0 }
 0x1ca   :  { %2341 = vmatmul.mubr.f32.vlgmr.msra.gmra.mrb[2].mxu1 %v3336_v31 }
 0x1cb   :  { %2728 = vmatpush3.bf16.msra.mxu1 %v3193_v43  ;;  %2375 = vmatprep.mubr.msk.f32.mxu1 %vm3061_vm0, %v3062_v1  ;;  %v1229_v43 = vld [vmem:[#allocation8 + $0x50] sm:$0xff] }
 0x1cc   :  { %2729 = vmatprep.subr.bf16.mxu1 %v3060_v0 }
 0x1cf   :  { %2731 = vmatpush3.bf16.msra.mxu1 %v3198_v44  ;;  %v1230_v44 = vld [vmem:[#allocation8 + $0x58] sm:$0xff] }
 0x1d0   :  { %2732 = vmatprep.subr.bf16.mxu1 %v3060_v0 }
 0x1d3   :  { %2734 = vmatpush3.bf16.msra.mxu1 %v3204_v45  ;;  %v1273_v45 = vand.u32 4294901760, %v1229_v43 }
 0x1d4   :  { %2735 = vmatprep.subr.bf16.mxu1 %v3060_v0 }
 0x1d5   :  { %v3529_v41 = vsub.f32 %v1229_v43, %v1273_v45  ;;  %v1387_v43 = vand.u32 4294901760, %v1386_v13  ;;  %v1435_v13 = vsub.f32 %v3538_v33, %v3760_v39 }
 0x1d7   :  { %2737 = vmatpush3.bf16.msra.mxu1 %v3209_v50  ;;  %v1276_v50 = vand.u32 4294901760, %v1230_v44  ;;  %v1406_v17 = vand.u32 4294901760, %v3529_v41 }
 0x1d8   :  { %2738 = vmatprep.subr.bf16.mxu1 %v3060_v0 }
 0x1d9   :  { %v3511_v14 = vpack.c.bf16 %v1276_v50, %v1273_v45  ;;  %v3531_v55 = vsub.f32 %v1230_v44, %v1276_v50  ;;  %v1392_v44 = vand.u32 4294901760, %v3387_v32  ;;  %v1399_v45 = vand.u32 4294901760, %v3389_v46 }
 0x1da   :  { %v2784_v50 = vpack.c.bf16 %v1387_v43, %v1380_v34  ;;  %v1436_v43 = vand.u32 4294901760, %v1435_v13 }
 0x1db   :  { %2740 = vmatpush3.bf16.msra.mxu1 %v3217_v57  ;;  %v1231_v57 = vld [vmem:[#allocation8 + $0x60] sm:$0xff]  ;;  %2767 = vmatpush3.bf16.msra.mxu0 %v3511_v14  ;;  %v1400_v15 = vsub.f32 %v3389_v46, %v1399_v45 }
 0x1dc   :  { %2741 = vmatprep.subr.bf16.mxu1 %v3060_v0  ;;  %2768 = vmatprep.subr.bf16.mxu0 %v3060_v0 }
 0x1df   :  { %2743 = vmatpush3.bf16.msra.mxu1 %v3221_v62  ;;  %v1279_v62 = vand.u32 4294901760, %v1231_v57 }
 0x1e0   :  { %2744 = vmatprep.subr.bf16.mxu1 %v3060_v0 }
 0x1e1   :  { %v3533_v56 = vsub.f32 %v1231_v57, %v1279_v62  ;;  %v1393_v57 = vsub.f32 %v3387_v32, %v1392_v44 }
 0x1e3   :  { %2746 = vmatpush3.bf16.msra.mxu1 %v3225_v5  ;;  %v3515_v5 = vpack.c.bf16 %v1282_v16, %v1279_v62  ;;  %v1394_v62 = vand.u32 4294901760, %v1393_v57  ;;  %v1401_v16 = vand.u32 4294901760, %v1400_v15 }
 0x1e4   :  { %2747 = vmatprep.subr.bf16.mxu1 %v3060_v0 }
 0x1e5   :  { %2770 = vmatpush3.bf16.msra.mxu0 %v3515_v5 }
 0x1e6   :  { %2771 = vmatprep.subr.bf16.mxu0 %v3060_v0 }
 0x1e7   :  { %2749 = vmatpush3.bf16.msra.mxu1 %v3243_v18  ;;  %v1234_v18 = vld [vmem:[#allocation8 + $0x78] sm:$0xff] }
 0x1e8   :  { %v1288_v20 = vand.u32 4294901760, %v1234_v18 }
 0x1ea   :  { %2376 = vmatmul.mubr.f32.vlgmr.msra.gmra.mrb[2].mxu1 %v3336_v31  ;;  %v1336_v31 = vand.u32 4294901760, %v3363_v3  ;;  %v3521_v47 = vpack.c.bf16 %v1288_v20, %v1285_v19  ;;  %v3540_v40 = vsub.f32 %v1234_v18, %v1288_v20  ;;  %v1413_v18 = vand.u32 4294901760, %v3531_v55 }
 0x1eb   :  { %v2787_v19 = vpack.c.bf16 %v1401_v16, %v1394_v62  ;;  %v1407_v20 = vsub.f32 %v3529_v41, %v1406_v17  ;;  %v2799_v62 = vpack.c.bf16 %v3365_v42, %v3363_v3  ;;  %v2802_v16 = vpack.c.bf16 %v3371_v48, %v3367_v60 }
 0x1ec   :  { %v1337_v52 = vsub.f32 %v3363_v3, %v1336_v31  ;;  %2773 = vmatpush3.bf16.msra.mxu0 %v3521_v47  ;;  %v3759_v30 = vand.u32 4294901760, %v3540_v40  ;;  %v2820_v25 = vpack.c.bf16 %v3540_v40, %v3538_v33  ;;  %v2853_v3 = vpack.c.bf16 %v1371_v28, %v1364_v11 }
 0x1ed   :  { %2774 = vmatprep.subr.bf16.mxu0 %v3060_v0  ;;  %v1408_v2 = vand.u32 4294901760, %v1407_v20  ;;  %v2805_v20 = vpack.c.bf16 %v3379_v37, %v3373_v38  ;;  %v2856_v48 = vpack.c.bf16 %v1385_v54, %v1378_v53  ;;  %v2859_v60 = vpack.c.bf16 %v1399_v45, %v1392_v44 }
 0x1ee   :  { %v1338_v61 = vand.u32 4294901760, %v1337_v52  ;;  %v1414_v52 = vsub.f32 %v3531_v55, %v1413_v18  ;;  %v1442_v34 = vsub.f32 %v3540_v40, %v3759_v30  ;;  %v2862_v37 = vpack.c.bf16 %v1413_v18, %v1406_v17 }
 0x1ef   :  { %v3775_v38 = vand.u32 4294901760, %v3533_v56  ;;  %v3776_v42 = vand.u32 4294901760, %v3535_v58 }
 0x1f0   :  { %v3545_v21 = vpack.c.bf16 %v1345_v51, %v1338_v61  ;;  %v1415_v61 = vand.u32 4294901760, %v1414_v52  ;;  %v3762_v51 = vand.u32 4294901760, %v3533_v56  ;;  %v1443_v57 = vand.u32 4294901760, %v1442_v34 }
 0x1f1   :  { %v2808_v52 = vpack.c.bf16 %v3385_v8, %v3383_v6  ;;  %v2865_v6 = vpack.c.bf16 %v3776_v42, %v3775_v38  ;;  %v3777_v8 = vand.u32 4294901760, %v3538_v33 }
 0x1f2   :  { %v2790_v10 = vpack.c.bf16 %v1415_v61, %v1408_v2  ;;  %v1421_v29 = vsub.f32 %v3533_v56, %v3762_v51  ;;  %v2796_v15 = vpack.c.bf16 %v1443_v57, %v1436_v43  ;;  %v2811_v2 = vpack.c.bf16 %v3389_v46, %v3387_v32 }
 0x1f3   :  { %v2814_v61 = vpack.c.bf16 %v3531_v55, %v3529_v41  ;;  %v3778_v32 = vand.u32 4294901760, %v3540_v40 }
 0x1f4   :  { %v1422_v26 = vand.u32 4294901760, %v1421_v29  ;;  %v2817_v29 = vpack.c.bf16 %v3535_v58, %v3533_v56 }
 0x1f5   :  { %v2868_v46 = vpack.c.bf16 %v3778_v32, %v3777_v8 }
 0x1f6   :  { %v2793_v12 = vpack.c.bf16 %v1429_v7, %v1422_v26  ;;  %v1902_v26 = vld [vmem:[%s3743_s4] ss:$0 sm:$0xff] }
 0x2bd   :  { %v1214_v7 = vpop.f32.mrb[2].mxu1 }
 0x2be   :  { %v2896_v13 = vadd.f32 %v1902_v26, %v1214_v7  ;;  %v2377_v34 = vpop.f32.mrb[3].mxu1 }
 0x2c0   :  { %v1218_v43 = vmax.f32 %v2896_v13, 0.0 }
 0x2c2   :  { %v3620_v57 = vand.u32 4294901760, %v1218_v43 }
 0x2c4   :  { %v1324_v30 = vsub.f32 %v1218_v43, %v3620_v57 }
 0x2c6   :  { %v1325_v39 = vand.u32 4294901760, %v1324_v30 }
 0x2c8   :  { %v1326_v22 = vsub.f32 %v1324_v30, %v1325_v39 }
 0x2ca   :  { %v1327_v51 = vand.u32 4294901760, %v1326_v22 }
 0x2cc   :  { %2411 = vmatmul.mubr.f32.vlgmr.msra.gmra.mrb[2].mxu0 %v1327_v51 }
 0x2cd   :  { %2776 = vmatpush3.bf16.msra.mxu0 %v3545_v21  ;;  %2445 = vmatprep.mubr.msk.f32.mxu0 %vm3061_vm0, %v3062_v1  ;;  %v2847_v21 = vpack.c.bf16 %v1343_v35, %v1336_v31 }
 0x2ce   :  { %2777 = vmatprep.subr.bf16.mxu0 %v3060_v0 }
 0x2d1   :  { %2779 = vmatpush3.bf16.msra.mxu0 %v2778_v36  ;;  %v2850_v36 = vpack.c.bf16 %v1357_v24, %v1350_v23 }
 0x2d2   :  { %2780 = vmatprep.subr.bf16.mxu0 %v3060_v0 }
 0x2d5   :  { %2782 = vmatpush3.bf16.msra.mxu0 %v2781_v27 }
 0x2d6   :  { %2783 = vmatprep.subr.bf16.mxu0 %v3060_v0 }
 0x2d9   :  { %2785 = vmatpush3.bf16.msra.mxu0 %v2784_v50 }
 0x2da   :  { %2786 = vmatprep.subr.bf16.mxu0 %v3060_v0 }
 0x2dd   :  { %2788 = vmatpush3.bf16.msra.mxu0 %v2787_v19 }
 0x2de   :  { %2789 = vmatprep.subr.bf16.mxu0 %v3060_v0 }
 0x2e1   :  { %2791 = vmatpush3.bf16.msra.mxu0 %v2790_v10 }
 0x2e2   :  { %2792 = vmatprep.subr.bf16.mxu0 %v3060_v0 }
 0x2e5   :  { %2794 = vmatpush3.bf16.msra.mxu0 %v2793_v12 }
 0x2e6   :  { %2795 = vmatprep.subr.bf16.mxu0 %v3060_v0 }
 0x2e9   :  { %2797 = vmatpush3.bf16.msra.mxu0 %v2796_v15 }
 0x2ea   :  { %2798 = vmatprep.subr.bf16.mxu0 %v3060_v0 }
 0x2ec   :  { %2446 = vmatmul.mubr.f32.vlgmr.msra.gmra.mrb[2].mxu0 %v3620_v57 }
 0x2ed   :  { %2800 = vmatpush3.bf16.msra.mxu0 %v2799_v62  ;;  %2480 = vmatprep.mubr.msk.f32.mxu0 %vm3061_vm0, %v3062_v1 }
 0x2ee   :  { %2801 = vmatprep.subr.bf16.mxu0 %v3060_v0 }
 0x2f1   :  { %2803 = vmatpush3.bf16.msra.mxu0 %v2802_v16 }
 0x2f2   :  { %2804 = vmatprep.subr.bf16.mxu0 %v3060_v0 }
 0x2f5   :  { %2806 = vmatpush3.bf16.msra.mxu0 %v2805_v20 }
 0x2f6   :  { %2807 = vmatprep.subr.bf16.mxu0 %v3060_v0 }
 0x2f9   :  { %2809 = vmatpush3.bf16.msra.mxu0 %v2808_v52 }
 0x2fa   :  { %2810 = vmatprep.subr.bf16.mxu0 %v3060_v0 }
 0x2fd   :  { %2812 = vmatpush3.bf16.msra.mxu0 %v2811_v2 }
 0x2fe   :  { %2813 = vmatprep.subr.bf16.mxu0 %v3060_v0 }
 0x301   :  { %2815 = vmatpush3.bf16.msra.mxu0 %v2814_v61 }
 0x302   :  { %2816 = vmatprep.subr.bf16.mxu0 %v3060_v0 }
 0x305   :  { %2818 = vmatpush3.bf16.msra.mxu0 %v2817_v29 }
 0x306   :  { %2819 = vmatprep.subr.bf16.mxu0 %v3060_v0 }
 0x309   :  { %2821 = vmatpush3.bf16.msra.mxu0 %v2820_v25 }
 0x30a   :  { %2822 = vmatprep.subr.bf16.mxu0 %v3060_v0 }
 0x30c   :  { %2481 = vmatmul.mubr.f32.vlgmr.msra.gmra.mrb[2].mxu0 %v1324_v30 }
 0x30d   :  { %2824 = vmatpush3.bf16.msra.mxu0 %v3361_v63  ;;  %2515 = vmatprep.mubr.msk.f32.mxu0 %vm3061_vm0, %v3062_v1 }
 0x30e   :  { %2825 = vmatprep.subr.bf16.mxu0 %v3060_v0 }
 0x311   :  { %2827 = vmatpush3.bf16.msra.mxu0 %v3369_v49 }
 0x312   :  { %2828 = vmatprep.subr.bf16.mxu0 %v3060_v0 }
 0x315   :  { %2830 = vmatpush3.bf16.msra.mxu0 %v3395_v4 }
 0x316   :  { %2831 = vmatprep.subr.bf16.mxu0 %v3060_v0 }
 0x319   :  { %2833 = vmatpush3.bf16.msra.mxu0 %v3403_v59 }
 0x31a   :  { %2834 = vmatprep.subr.bf16.mxu0 %v3060_v0 }
 0x31d   :  { %2836 = vmatpush3.bf16.msra.mxu0 %v3411_v9 }
 0x31e   :  { %2837 = vmatprep.subr.bf16.mxu0 %v3060_v0 }
 0x321   :  { %2839 = vmatpush3.bf16.msra.mxu0 %v3511_v14 }
 0x322   :  { %2840 = vmatprep.subr.bf16.mxu0 %v3060_v0 }
 0x325   :  { %2842 = vmatpush3.bf16.msra.mxu0 %v3515_v5 }
 0x326   :  { %2843 = vmatprep.subr.bf16.mxu0 %v3060_v0 }
 0x329   :  { %2845 = vmatpush3.bf16.msra.mxu0 %v3521_v47 }
 0x32a   :  { %2846 = vmatprep.subr.bf16.mxu0 %v3060_v0 }
 0x32c   :  { %2516 = vmatmul.mubr.f32.vlgmr.msra.gmra.mrb[2].mxu0 %v1325_v39 }
 0x32d   :  { %2848 = vmatpush3.bf16.msra.mxu0 %v2847_v21  ;;  %2550 = vmatprep.mubr.msk.f32.mxu0 %vm3061_vm0, %v3062_v1 }
 0x32e   :  { %2849 = vmatprep.subr.bf16.mxu0 %v3060_v0 }
 0x331   :  { %2851 = vmatpush3.bf16.msra.mxu0 %v2850_v36 }
 0x332   :  { %2852 = vmatprep.subr.bf16.mxu0 %v3060_v0 }
 0x335   :  { %2854 = vmatpush3.bf16.msra.mxu0 %v2853_v3 }
 0x336   :  { %2855 = vmatprep.subr.bf16.mxu0 %v3060_v0 }
 0x339   :  { %2857 = vmatpush3.bf16.msra.mxu0 %v2856_v48 }
 0x33a   :  { %2858 = vmatprep.subr.bf16.mxu0 %v3060_v0 }
 0x33d   :  { %2860 = vmatpush3.bf16.msra.mxu0 %v2859_v60 }
 0x33e   :  { %2861 = vmatprep.subr.bf16.mxu0 %v3060_v0 }
 0x341   :  { %2863 = vmatpush3.bf16.msra.mxu0 %v2862_v37 }
 0x342   :  { %2864 = vmatprep.subr.bf16.mxu0 %v3060_v0 }
 0x345   :  { %2866 = vmatpush3.bf16.msra.mxu0 %v2865_v6 }
 0x346   :  { %2867 = vmatprep.subr.bf16.mxu0 %v3060_v0 }
 0x349   :  { %2869 = vmatpush3.bf16.msra.mxu0 %v2868_v46 }
 0x34a   :  { %2870 = vmatprep.subr.bf16.mxu0 %v3060_v0 }
 0x34c   :  { %2551 = vmatmul.mubr.f32.vlgmr.msra.gmra.mrb[2].mxu0 %v3620_v57 }
 0x34d   :  { %2872 = vmatpush3.bf16.msra.mxu0 %v3361_v63  ;;  %2585 = vmatprep.mubr.msk.f32.mxu0 %vm3061_vm0, %v3062_v1  ;;  %v1903_v1 = vld [vmem:[%s3745_s6] ss:$0 sm:$0xff] }
 0x34e   :  { %2873 = vmatprep.subr.bf16.mxu0 %v3060_v0 }
 0x351   :  { %2875 = vmatpush3.bf16.msra.mxu0 %v3369_v49 }
 0x352   :  { %2876 = vmatprep.subr.bf16.mxu0 %v3060_v0 }
 0x355   :  { %2878 = vmatpush3.bf16.msra.mxu0 %v3395_v4 }
 0x356   :  { %2879 = vmatprep.subr.bf16.mxu0 %v3060_v0 }
 0x359   :  { %2881 = vmatpush3.bf16.msra.mxu0 %v3403_v59 }
 0x35a   :  { %2882 = vmatprep.subr.bf16.mxu0 %v3060_v0 }
 0x35d   :  { %2884 = vmatpush3.bf16.msra.mxu0 %v3411_v9 }
 0x35e   :  { %2885 = vmatprep.subr.bf16.mxu0 %v3060_v0 }
 0x361   :  { %2887 = vmatpush3.bf16.msra.mxu0 %v3511_v14 }
 0x362   :  { %2888 = vmatprep.subr.bf16.mxu0 %v3060_v0 }
 0x365   :  { %2890 = vmatpush3.bf16.msra.mxu0 %v3515_v5 }
 0x366   :  { %2891 = vmatprep.subr.bf16.mxu0 %v3060_v0 }
 0x369   :  { %2893 = vmatpush3.bf16.msra.mxu0 %v3521_v47 }
 0x36c   :  { %2586 = vmatmul.mubr.f32.vlgmr.msra.gmra.mrb[2].mxu0 %v3620_v57 }
 0x43f   :  { %v1879_v49 = vpop.f32.mrb[2].mxu0 }
 0x440   :  { %v2897_v63 = vadd.f32 %v1903_v1, %v1879_v49  ;;  %v2587_v4 = vpop.f32.mrb[3].mxu0 }
 0x442   :  { %1883 = vst [vmem:[#allocation10] sm:$0xff] %v2897_v63 }
 0x443   :  { %3035 = shalt.err (!%p3032_p8)
}
 0x444   :  { %s3036_s9 = scalar_lea.hbm %s3746_s7, 128 }
 0x445   :  { %p3037_p9 = scmp.ne.s32.totalorder %s3746_s7, %s3036_s9  ;;  %p3040_p10 = scmp.lt.u32.totalorder %s3036_s9, %s3746_s7 }
 0x447   :  { %p3042_p11 = pnand %p3040_p10, %p3037_p9 }
 0x449   :  { %3045 = shalt.err (!%p3042_p11)
}
 0x44a   :  { %1893 = dma.vmem_to_hbm [thread:$0]  %s1891_s28, 128, %s3746_s7, [#allocation4]  }
 0x44b   :  { %3052 = dma.done.wait [#allocation4], 128  }
 0x44c   :  { %3053 = vsyncadd [#allocation4], 4294967168 }
 0x44d   :  { %1897 = vsyncpa [#allocation3], 1 }
 0x44e   :  { %1898 = vsyncpa [#allocation6], 1 }
 0x44f   :  { %1899 = vsyncpa [#allocation9], 1 }
 0x450   :  { %1900 = vsyncpa [#allocation4], 1 }

</bundles_post_ra>
